<compile_context>
chip_gen: v6e
topology: v6e:2x2x1
jax: 0.10.0
libtpu: 0.0.40
codegen_flags: <defaults>
</compile_context>

<pallas_src>
import math

import jax
import jax.numpy as jnp
from jax.experimental import pallas as pl
from jax.experimental.pallas import tpu as pltpu

IN_FEATURES = 2
OUT_FEATURES = 3

LANES = 128          # vreg lane width
SUBLANES = 8         # vreg sublane depth (f32)
MAX_TILE_ROWS = 2048 # 2048 sublane rows x 128 lanes = 256K samples per grid step
                     #   -> ~10 MiB double-buffered f32 (fits default scoped VMEM
                     #      on v5e/v6e/v7x); big enough to sit near HBM roofline.
SMALL_BATCH_THRESHOLD = 4096  # below this, plain XLA beats any Pallas launch


def linear_kernel(p_ref, x_ref, o_ref):
    # p_ref (SMEM, f32[9]): [w00, w01, w10, w11, w20, w21, b0, b1, b2]
    #   (PyTorch weight layout w[j, k]: j = out feature, k = in feature)
    # x_ref (VMEM): [2, S, 128]  -- x_ref[k] is a dense [S, 128] slab of feature k
    # o_ref (VMEM): [3, S, 128]  -- o_ref[j] is a dense [S, 128] slab of output j
    x0 = x_ref[0]
    x1 = x_ref[1]
    for j in range(OUT_FEATURES):  # unrolled: 3 dense VPU FMA chains + unmasked stores
        w0 = p_ref[2 * j]
        w1 = p_ref[2 * j + 1]
        b = p_ref[2 * OUT_FEATURES + j]
        o_ref[j] = (x0 * w0 + x1 * w1 + b).astype(o_ref.dtype)


def linear_forward(x, weight, bias, *, use_pallas=None):
    """x: [N, 2], weight: [3, 2] (PyTorch layout), bias: [3] -> [N, 3]."""
    N = x.shape[0]
    if use_pallas is None:
        use_pallas = N >= SMALL_BATCH_THRESHOLD
    if not use_pallas:
        # Small-batch fast path: a single fused XLA op beats any kernel launch.
        return x @ weight.T + bias

    # ---- static tile geometry (all Python ints) ----
    rows = math.ceil(N / LANES)                       # sublane rows needed
    rows = math.ceil(rows / SUBLANES) * SUBLANES      # multiple of 8
    tile_rows = min(rows, MAX_TILE_ROWS)              # per-step sublane rows
    n_rows = math.ceil(rows / tile_rows) * tile_rows  # grid-aligned total rows
    n_pad = n_rows * LANES

    # Wrapper-side layout plumbing: feature-major, zero-padded, then a FREE
    # contiguous reshape to [features, n_rows, 128] so the kernel sees dense
    # [S, 128] slabs. Padded tail columns only ever hold bias values and are
    # sliced away below.
    x_t = jnp.zeros((IN_FEATURES, n_pad), x.dtype).at[:, :N].set(x.T)
    x_t3 = x_t.reshape(IN_FEATURES, n_rows, LANES)
    params = jnp.concatenate(
        [weight.reshape(-1), bias.reshape(-1)]).astype(jnp.float32)

    out_t3 = pl.pallas_call(
        linear_kernel,
        out_shape=jax.ShapeDtypeStruct((OUT_FEATURES, n_rows, LANES), x.dtype),
        grid_spec=pltpu.PrefetchScalarGridSpec(
            num_scalar_prefetch=0,
            grid=(n_rows // tile_rows,),
            in_specs=[
                # 9 scalars -> SMEM-resident, read as scalars in the kernel.
                pl.BlockSpec(memory_space=pltpu.MemorySpace.SMEM),
                # Leading dim equals full array dim (2); trailing (tile_rows, 128)
                # satisfies the (8, 128) rule and is fully dense.
                pl.BlockSpec((IN_FEATURES, tile_rows, LANES),
                             lambda i: (0, i, 0)),
            ],
            out_specs=pl.BlockSpec((OUT_FEATURES, tile_rows, LANES),
                                   lambda i: (0, i, 0)),
        ),
        compiler_params=pltpu.CompilerParams(
            # Batch tiles are independent -> shard across v7x's 2 TensorCores.
            dimension_semantics=("parallel",),
        ),
        cost_estimate=pl.CostEstimate(
            flops=5 * OUT_FEATURES * n_pad,      # 2 mul + 2 add + bias per out row
            transcendentals=0,
            bytes_accessed=(IN_FEATURES + OUT_FEATURES) * n_pad * x.dtype.itemsize,
        ),
    )(params, x_t3)

    out_t = out_t3.reshape(OUT_FEATURES, n_pad)
    return out_t[:, :N].T


class MultiClassClassifier:
    """JAX/Pallas port of the PyTorch MultiClassClassifier (nn.Linear(2, 3))."""

    def __init__(self, key):
        k_w, k_b = jax.random.split(key)
        # Match PyTorch nn.Linear default init: U(-1/sqrt(fan_in), 1/sqrt(fan_in))
        bound = 1.0 / jnp.sqrt(jnp.float32(IN_FEATURES))
        # Keep the native PyTorch layout: weight [out, in], bias [out].
        self.weight = jax.random.uniform(
            k_w, (OUT_FEATURES, IN_FEATURES), jnp.float32, -bound, bound)
        self.bias = jax.random.uniform(
            k_b, (OUT_FEATURES,), jnp.float32, -bound, bound)

    def __call__(self, x):
        # Auto-dispatch: small batches take the plain-XLA path, large batches
        # go through the Pallas kernel.
        return linear_forward(x, self.weight, self.bias)


if __name__ == "__main__":
    key = jax.random.PRNGKey(0)
    k_params, k_x = jax.random.split(key)

    model = MultiClassClassifier(k_params)

    # Small batch of 8 samples with 2 features each (Linear(2, 3) input).
    x = jax.random.normal(k_x, (8, IN_FEATURES), dtype=jnp.float32)

    # Reference (PyTorch semantics: x @ W.T + b).
    ref = x @ model.weight.T + model.bias

    # 1) Auto-dispatch path (small N -> plain XLA fast path).
    out_auto = jax.block_until_ready(model(x))
    assert out_auto.shape == (8, OUT_FEATURES)
    assert jnp.allclose(out_auto, ref, atol=1e-5, rtol=1e-5)

    # 2) Forced Pallas path (exercises the kernel even at tiny N).
    out_pallas = jax.block_until_ready(
        linear_forward(x, model.weight, model.bias, use_pallas=True))
    assert out_pallas.shape == (8, OUT_FEATURES)
    assert jnp.allclose(out_pallas, ref, atol=1e-5, rtol=1e-5)

    print("KERNEL_OK")
</pallas_src>

<mosaic_0001>
module attributes {stable_mosaic.version = 11 : i64} {
  func.func @linear_kernel(%arg0: i32, %arg1: memref<9xf32, #tpu.memory_space<smem>>, %arg2: memref<2x8x128xf32, #tpu.memory_space<vmem>>, %arg3: memref<3x8x128xf32, #tpu.memory_space<vmem>>) attributes {dimension_semantics = [#tpu.dimension_semantics<parallel>], iteration_bounds = array<i64: 1>, scalar_prefetch = 0 : i64, scratch_operands = 0 : i64, tpu.core_type = #tpu.core_type<tc>, window_params = [{transform_indices = @transform_0, window_bounds = array<i64: 9>}, {transform_indices = @transform_1, window_bounds = array<i64: 2, 8, 128>}, {transform_indices = @transform_2, window_bounds = array<i64: 3, 8, 128>}]} {
    %c0 = arith.constant 0 : index
    %c0_0 = arith.constant 0 : index
    %c0_1 = arith.constant 0 : index
    %0 = vector.load %arg2[%c0, %c0_0, %c0_1] : memref<2x8x128xf32, #tpu.memory_space<vmem>>, vector<1x8x128xf32>
    %1 = vector.shape_cast %0 : vector<1x8x128xf32> to vector<8x128xf32>
    %c1 = arith.constant 1 : index
    %c0_2 = arith.constant 0 : index
    %c0_3 = arith.constant 0 : index
    %2 = vector.load %arg2[%c1, %c0_2, %c0_3] : memref<2x8x128xf32, #tpu.memory_space<vmem>>, vector<1x8x128xf32>
    %3 = vector.shape_cast %2 : vector<1x8x128xf32> to vector<8x128xf32>
    %c0_4 = arith.constant 0 : index
    %4 = memref.load %arg1[%c0_4] : memref<9xf32, #tpu.memory_space<smem>>
    %c1_5 = arith.constant 1 : index
    %5 = memref.load %arg1[%c1_5] : memref<9xf32, #tpu.memory_space<smem>>
    %c6 = arith.constant 6 : index
    %6 = memref.load %arg1[%c6] : memref<9xf32, #tpu.memory_space<smem>>
    %7 = vector.broadcast %4 : f32 to vector<8x128xf32>
    %8 = arith.mulf %1, %7 : vector<8x128xf32>
    %9 = vector.broadcast %5 : f32 to vector<8x128xf32>
    %10 = arith.mulf %3, %9 : vector<8x128xf32>
    %11 = arith.addf %8, %10 : vector<8x128xf32>
    %12 = vector.broadcast %6 : f32 to vector<8x128xf32>
    %13 = arith.addf %11, %12 : vector<8x128xf32>
    %c0_6 = arith.constant 0 : index
    %c0_7 = arith.constant 0 : index
    %c0_8 = arith.constant 0 : index
    %14 = vector.load %arg3[%c0_6, %c0_7, %c0_8] : memref<3x8x128xf32, #tpu.memory_space<vmem>>, vector<1x8x128xf32>
    %15 = vector.shape_cast %14 : vector<1x8x128xf32> to vector<8x128xf32>
    %16 = vector.shape_cast %13 : vector<8x128xf32> to vector<1x8x128xf32>
    tpu.vector_store %arg3[%c0_6, %c0_7, %c0_8], %16 {strides = array<i32>} : memref<3x8x128xf32, #tpu.memory_space<vmem>>, vector<1x8x128xf32>,
    %c2 = arith.constant 2 : index
    %17 = memref.load %arg1[%c2] : memref<9xf32, #tpu.memory_space<smem>>
    %c3 = arith.constant 3 : index
    %18 = memref.load %arg1[%c3] : memref<9xf32, #tpu.memory_space<smem>>
    %c7 = arith.constant 7 : index
    %19 = memref.load %arg1[%c7] : memref<9xf32, #tpu.memory_space<smem>>
    %20 = vector.broadcast %17 : f32 to vector<8x128xf32>
    %21 = arith.mulf %1, %20 : vector<8x128xf32>
    %22 = vector.broadcast %18 : f32 to vector<8x128xf32>
    %23 = arith.mulf %3, %22 : vector<8x128xf32>
    %24 = arith.addf %21, %23 : vector<8x128xf32>
    %25 = vector.broadcast %19 : f32 to vector<8x128xf32>
    %26 = arith.addf %24, %25 : vector<8x128xf32>
    %c1_9 = arith.constant 1 : index
    %c0_10 = arith.constant 0 : index
    %c0_11 = arith.constant 0 : index
    %27 = vector.load %arg3[%c1_9, %c0_10, %c0_11] : memref<3x8x128xf32, #tpu.memory_space<vmem>>, vector<1x8x128xf32>
    %28 = vector.shape_cast %27 : vector<1x8x128xf32> to vector<8x128xf32>
    %29 = vector.shape_cast %26 : vector<8x128xf32> to vector<1x8x128xf32>
    tpu.vector_store %arg3[%c1_9, %c0_10, %c0_11], %29 {strides = array<i32>} : memref<3x8x128xf32, #tpu.memory_space<vmem>>, vector<1x8x128xf32>,
    %c4 = arith.constant 4 : index
    %30 = memref.load %arg1[%c4] : memref<9xf32, #tpu.memory_space<smem>>
    %c5 = arith.constant 5 : index
    %31 = memref.load %arg1[%c5] : memref<9xf32, #tpu.memory_space<smem>>
    %c8 = arith.constant 8 : index
    %32 = memref.load %arg1[%c8] : memref<9xf32, #tpu.memory_space<smem>>
    %33 = vector.broadcast %30 : f32 to vector<8x128xf32>
    %34 = arith.mulf %1, %33 : vector<8x128xf32>
    %35 = vector.broadcast %31 : f32 to vector<8x128xf32>
    %36 = arith.mulf %3, %35 : vector<8x128xf32>
    %37 = arith.addf %34, %36 : vector<8x128xf32>
    %38 = vector.broadcast %32 : f32 to vector<8x128xf32>
    %39 = arith.addf %37, %38 : vector<8x128xf32>
    %c2_12 = arith.constant 2 : index
    %c0_13 = arith.constant 0 : index
    %c0_14 = arith.constant 0 : index
    %40 = vector.load %arg3[%c2_12, %c0_13, %c0_14] : memref<3x8x128xf32, #tpu.memory_space<vmem>>, vector<1x8x128xf32>
    %41 = vector.shape_cast %40 : vector<1x8x128xf32> to vector<8x128xf32>
    %42 = vector.shape_cast %39 : vector<8x128xf32> to vector<1x8x128xf32>
    tpu.vector_store %arg3[%c2_12, %c0_13, %c0_14], %42 {strides = array<i32>} : memref<3x8x128xf32, #tpu.memory_space<vmem>>, vector<1x8x128xf32>,
    return
  }
  func.func @transform_0(%arg0: i32) -> i32 {
    %c0_i32 = arith.constant 0 : i32
    %c0_i32_0 = arith.constant 0 : i32
    return %c0_i32 : i32
  }
  func.func @transform_1(%arg0: i32) -> (i32, i32, i32) {
    %c0_i32 = arith.constant 0 : i32
    %c0_i32_0 = arith.constant 0 : i32
    %c0_i32_1 = arith.constant 0 : i32
    return %c0_i32, %arg0, %c0_i32_0 : i32, i32, i32
  }
  func.func @transform_2(%arg0: i32) -> (i32, i32, i32) {
    %c0_i32 = arith.constant 0 : i32
    %c0_i32_0 = arith.constant 0 : i32
    %c0_i32_1 = arith.constant 0 : i32
    return %c0_i32, %arg0, %c0_i32_0 : i32, i32, i32
  }
}

</mosaic_0001>

<bundles_post_ra>
// kernel: tpu_custom_call.1
= control target key start
LH: loop header
LB: loop body
LE: loop exit
PB: predicated region body
PF: predicated region fallthrough
CT: control target
= control target key end

     0   :  { %7 = vsyncpa [#allocation5], 0  ;;  %s195_s0 = inlined_call_operand.hbm [shape: f32[9], index: 0, kind: input, shape index: {}]   ;;  %s196_s1 = inlined_call_operand.hbm [shape: f32[2,8,128], index: 1, kind: input, shape index: {}]   ;;  %s197_s2 = inlined_call_operand.hbm [shape: f32[3,8,128], index: 2, kind: output, shape index: {}]  }
   0x1   :  { %8 = vsyncpa [#allocation3], 0 }
   0x2   :  { %9 = vsyncpa [#allocation4], 0  ;;  %s160_s9 = smov [#allocation2]   ;;  %s161_s12 = smov [#allocation6]  }
   0x3   :  { %17 = dma.hbm_to_smem %s195_s0, 16, %s160_s9, [#allocation5]  }
   0x4   :  { %s23_s13 = sshll.u32 %s161_s12, 4  ;;  %s24_s13 = int_to_ptr.vmem [resolvable:$true] %s23_s13 }
   0x5   :  { %s122_s14 = scalar_lea.vmem %s24_s13, 256  ;;  %p127_p1 = scmp.lt.s32.totalorder %s24_s13, %s24_s13 }
   0x6   :  { %p123_p0 = scmp.ne.s32.totalorder %s24_s13, %s122_s14  ;;  %p128_p2 = scmp.lt.s32.totalorder %s122_s14, %s122_s14 }
   0x8   :  { %p129_p3 = por %p128_p2, %p127_p1 }
   0xa   :  { %p130_p4 = pnand %p129_p3, %p123_p0 }
   0xc   :  { %133 = shalt.err (!%p130_p4)
}
   0xd   :  { %s162_s15 = smov 128   ;;  %s163_s16 = smov 8  }
   0xe   :  { %29 = dma.hbm_to_vmem [thread:$0]  %s196_s1, 256, %s24_s13, [#allocation3], %s162_s15, %s162_s15, %s163_s16  }
   0xf   :  { %154 = dma.done.wait [#allocation5], 16  }
  0x10   :  { %155 = vsyncadd [#allocation5], 4294967280 }
  0x11   :  { %156 = dma.done.wait [#allocation3], 256  }
  0x12   :  { %157 = vsyncadd [#allocation3], 4294967040 }
  0x13   :  { %36 = sfence }
  0x14   :  { %s40_s0 = sld [smem:[#allocation2]]  ;;  %v37_v0 = vld [vmem:[#allocation6] sm:$0xff]  ;;  %v39_v1 = vld [vmem:[#allocation6 + $0x8] sm:$0xff]  ;;  %s164_s26 = smov [#allocation7]  }
  0x15   :  { %s93_s19 = sld [smem:[#allocation2 + $0x1]]  ;;  %s80_s27 = sshll.u32 %s164_s26, 4  ;;  %s81_s27 = int_to_ptr.vmem [resolvable:$true] %s80_s27 }
  0x16   :  { %s94_s20 = sld [smem:[#allocation2 + $0x6]]  ;;  %s134_s28 = scalar_lea.vmem %s81_s27, 384 }
  0x17   :  { %s95_s21 = sld [smem:[#allocation2 + $0x2]]  ;;  %p135_p5 = scmp.ne.s32.totalorder %s81_s27, %s134_s28 }
  0x18   :  { %s96_s22 = sld [smem:[#allocation2 + $0x3]]  ;;  %p139_p6 = scmp.lt.s32.totalorder %s81_s27, %s81_s27 }
  0x19   :  { %s97_s23 = sld [smem:[#allocation2 + $0x7]]  ;;  %p140_p7 = scmp.lt.s32.totalorder %s134_s28, %s134_s28 }
  0x1a   :  { %v43_v2 = vstv %s40_s0  ;;  %s98_s24 = sld [smem:[#allocation2 + $0x4]] }
  0x1b   :  { %v44_v3 = vmul.f32 %v43_v2, %v37_v0  ;;  %v45_v4 = vstv %s93_s19  ;;  %s99_s25 = sld [smem:[#allocation2 + $0x5]]  ;;  %p141_p8 = por %p140_p7, %p139_p6 }
  0x1c   :  { %v46_v5 = vmul.f32 %v45_v4, %v39_v1  ;;  %s100_s1 = sld [smem:[#allocation2 + $0x8]]  ;;  %v48_v6 = vstv %s94_s20 }
  0x1d   :  { %v54_v7 = vstv %s95_s21  ;;  %p142_p9 = pnand %p141_p8, %p135_p5 }
  0x1e   :  { %v47_v8 = vadd.f32 %v46_v5, %v44_v3  ;;  %v55_v9 = vmul.f32 %v54_v7, %v37_v0  ;;  %v56_v10 = vstv %s96_s22 }
  0x1f   :  { %v57_v11 = vmul.f32 %v56_v10, %v39_v1  ;;  %v59_v13 = vstv %s97_s23 }
  0x20   :  { %v49_v12 = vadd.f32 %v48_v6, %v47_v8  ;;  %v66_v14 = vstv %s98_s24 }
  0x21   :  { %v58_v15 = vadd.f32 %v57_v11, %v55_v9  ;;  %v67_v16 = vmul.f32 %v66_v14, %v37_v0  ;;  %v68_v17 = vstv %s99_s25 }
  0x22   :  { %50 = vst [vmem:[#allocation7] sm:$0xff] %v49_v12  ;;  %v69_v18 = vmul.f32 %v68_v17, %v39_v1  ;;  %v71_v20 = vstv %s100_s1 }
  0x23   :  { %v60_v19 = vadd.f32 %v59_v13, %v58_v15 }
  0x24   :  { %v70_v21 = vadd.f32 %v69_v18, %v67_v16 }
  0x25   :  { %62 = vst [vmem:[#allocation7 + $0x8] sm:$0xff] %v60_v19 }
  0x26   :  { %v72_v22 = vadd.f32 %v71_v20, %v70_v21 }
  0x28   :  { %74 = vst [vmem:[#allocation7 + $0x10] sm:$0xff] %v72_v22 }
  0x29   :  { %145 = shalt.err (!%p142_p9)
}
  0x2a   :  { %86 = dma.vmem_to_hbm [thread:$0]  %s81_s27, 384, %s197_s2, [#allocation4], %s162_s15, %s162_s15, %s163_s16  }
  0x2b   :  { %158 = dma.done.wait [#allocation4], 384  }
  0x2c   :  { %159 = vsyncadd [#allocation4], 4294966912 }
  0x2d   :  { %90 = vsyncpa [#allocation3], 1 }
  0x2e   :  { %91 = vsyncpa [#allocation4], 1 }
  0x2f   :  { %92 = vsyncpa [#allocation5], 1 }

</bundles_post_ra>
